<compile_context>
chip_gen: v7x
topology: tpu7x:2x2x1
jax: 0.10.0
libtpu: 0.0.40
codegen_flags: <defaults>
</compile_context>

<pallas_src>
import math

import jax
import jax.numpy as jnp
from jax.experimental import pallas as pl
from jax.experimental.pallas import tpu as pltpu


# ---------------------------------------------------------------------------
# Kernels
# ---------------------------------------------------------------------------

def _swish_scalar_kernel(x_ref, beta_ref, o_ref):
    """beta is a single scalar living in SMEM as a (1, 1) f32 array."""
    b = beta_ref[0, 0].astype(jnp.float32)
    x = x_ref[...].astype(jnp.float32)
    z = x * b
    sig = 0.5 * jnp.tanh(0.5 * z) + 0.5          # sigmoid(z), single EUP op
    o_ref[...] = (x * sig).astype(o_ref.dtype)


def _swish_beta_kernel(x_ref, beta_ref, o_ref):
    """beta tile is either a (1, W) row or a (tm, 1) column; jnp broadcasting
    against the (tm, W) x tile covers both layouts."""
    x = x_ref[...].astype(jnp.float32)
    b = beta_ref[...].astype(jnp.float32)
    z = x * b
    sig = 0.5 * jnp.tanh(0.5 * z) + 0.5          # sigmoid(z), single EUP op
    o_ref[...] = (x * sig).astype(o_ref.dtype)


# ---------------------------------------------------------------------------
# Tiling helpers
# ---------------------------------------------------------------------------

def _row_tile(m_rows, lane_w, itemsize, extra_row_bytes=0,
              vmem_budget=12 * 1024 * 1024):
    """Pick the row tile.

    Budget: double-buffered input + output tiles (+ any per-row extra such as a
    lane-padded (tm, 1)->(tm, 128) f32 beta column) must fit in `vmem_budget`
    (12 MiB keeps us under v5e's 16 MiB default scoped VMEM; plenty of headroom
    on v6e/v7x).  Rows are a multiple of the sublane packing (8 for 32-bit, 16
    for 16-bit dtypes), capped at 4096.  Mid-size inputs are split into >= 2
    blocks so the 'parallel' grid axis shards across v7x's 2 TensorCores.
    """
    row_align = 16 if itemsize <= 2 else 8
    per_row = 2 * (2 * lane_w * itemsize + extra_row_bytes)   # double-buffered
    tm = vmem_budget // max(1, per_row)
    tm = max(row_align, min(4096, int(tm)))
    tm = (tm // row_align) * row_align
    if tm >= m_rows:
        if m_rows >= 2 * row_align:
            half = (m_rows + 1) // 2
            half = ((half + row_align - 1) // row_align) * row_align
            return min(half, m_rows)       # >= 2 blocks, still a multiple of 8
        return m_rows                      # tiny input: one full-dim block
    return tm


def _pick_lane_width(total):
    """Largest 'nice' multiple of 128 that divides the flat element count."""
    for w in (2048, 1024, 512, 256, 128):
        if total % w == 0:
            return w
    return None


def _pick_row_pack(m_rows, d):
    """Return k so x.reshape(M//k, k*D) has a lane dim that is a multiple of
    128 (k == 1 means no repack possible)."""
    if d % 128 == 0:
        return 1
    k = 128 // math.gcd(d, 128)
    if m_rows % k != 0 or k * d > 4096:
        return 1
    # Widen further (bigger multiple of 128 lanes) while it still divides M.
    while (m_rows % (2 * k) == 0) and (2 * k * d <= 2048):
        k *= 2
    return k


# ---------------------------------------------------------------------------
# pallas_call wrappers
# ---------------------------------------------------------------------------

def _swish_call_scalar(x2, beta11):
    m_rows, lane_w = x2.shape
    tm = _row_tile(m_rows, lane_w, x2.dtype.itemsize)
    grid = (pl.cdiv(m_rows, tm),)
    return pl.pallas_call(
        _swish_scalar_kernel,
        out_shape=jax.ShapeDtypeStruct((m_rows, lane_w), x2.dtype),
        grid_spec=pltpu.PrefetchScalarGridSpec(
            num_scalar_prefetch=0,
            grid=grid,
            in_specs=[
                pl.BlockSpec((tm, lane_w), lambda i: (i, 0)),
                # scalar beta lives in SMEM (no (8,128)-padded VMEM tile)
                pl.BlockSpec(memory_space=pltpu.MemorySpace.SMEM),
            ],
            out_specs=pl.BlockSpec((tm, lane_w), lambda i: (i, 0)),
        ),
        compiler_params=pltpu.CompilerParams(
            dimension_semantics=("parallel",)),
    )(x2, beta11)


def _swish_call_beta(x2, beta2):
    m_rows, lane_w = x2.shape
    if beta2.shape[0] == 1:
        # (1, W) row broadcast over rows (lane-dense repacked 2D path); the
        # beta tile is a single lane-padded row -> negligible VMEM.
        extra = 0
    else:
        # (M, 1) per-row (per-channel) column; lane-pads to (tm, 128) f32.
        extra = 128 * 4
    tm = _row_tile(m_rows, lane_w, x2.dtype.itemsize, extra_row_bytes=extra)
    grid = (pl.cdiv(m_rows, tm),)
    if beta2.shape[0] == 1:
        b_spec = pl.BlockSpec((1, beta2.shape[1]), lambda i: (0, 0))
    else:
        b_spec = pl.BlockSpec((tm, 1), lambda i: (i, 0))
    return pl.pallas_call(
        _swish_beta_kernel,
        out_shape=jax.ShapeDtypeStruct((m_rows, lane_w), x2.dtype),
        grid_spec=pltpu.PrefetchScalarGridSpec(
            num_scalar_prefetch=0,
            grid=grid,
            in_specs=[
                pl.BlockSpec((tm, lane_w), lambda i: (i, 0)),
                b_spec,
            ],
            out_specs=pl.BlockSpec((tm, lane_w), lambda i: (i, 0)),
        ),
        compiler_params=pltpu.CompilerParams(
            dimension_semantics=("parallel",)),
    )(x2, beta2)


# ---------------------------------------------------------------------------
# Public wrapper (matches the PyTorch module's forward)
# ---------------------------------------------------------------------------

def swish_pallas(x, beta):
    """Swish forward matching the PyTorch module for 2D or 4D (NCHW) inputs."""
    beta = jnp.asarray(beta, dtype=jnp.float32).reshape(-1)

    if beta.size == 1:
        # dim <= 0 case: uniform scalar beta -> flatten to a lane-dense slab
        # regardless of rank; no transposes, single HBM pass.
        total = x.size
        lane_w = _pick_lane_width(total)
        if lane_w is not None:
            x2 = x.reshape(total // lane_w, lane_w)
            out2 = _swish_call_scalar(x2, beta.reshape(1, 1))
            return out2.reshape(x.shape)
        # Fallback: flat size not a multiple of 128 -> zero-pad the tail so
        # stores stay full-width (no masked vst), then slice the pad off.
        pad = (-total) % 128
        flat = jnp.pad(x.reshape(-1), (0, pad))
        lane_w = _pick_lane_width(flat.size)
        x2 = flat.reshape(flat.size // lane_w, lane_w)
        out2 = _swish_call_scalar(x2, beta.reshape(1, 1))
        return out2.reshape(-1)[:total].reshape(x.shape)

    if x.ndim == 2:
        m_rows, d = x.shape
        k = _pick_row_pack(m_rows, d)
        if d % 128 == 0 or k > 1:
            # Lane-dense repack: (M, D) -> (M/k, k*D), beta tiled to match.
            x2 = x.reshape(m_rows // k, k * d)
            beta_row = jnp.tile(beta, k).reshape(1, k * d)
            out2 = _swish_call_beta(x2, beta_row)
            return out2.reshape(m_rows, d)
        # Fallback: can't repack -> pad D up to a multiple of 128 lanes.
        d_pad = ((d + 127) // 128) * 128
        x_p = jnp.pad(x, ((0, 0), (0, d_pad - d)))
        beta_row = jnp.pad(beta, (0, d_pad - d)).reshape(1, d_pad)
        out_p = _swish_call_beta(x_p, beta_row)
        return out_p[:, :d]

    if x.ndim == 4:
        # Stay in NCHW: view as (N*C, H*W) with the spatial axis lane-dense and
        # a per-row (== per-channel) beta column -> no transpose round-trip.
        n, c, h, w = x.shape
        hw = h * w
        x2 = x.reshape(n * c, hw)
        beta_col = jnp.tile(beta, n).reshape(n * c, 1)
        if hw % 128 != 0:
            # Pad the spatial lane dim so stores stay unmasked; slice back.
            hw_pad = ((hw + 127) // 128) * 128
            x2 = jnp.pad(x2, ((0, 0), (0, hw_pad - hw)))
            out2 = _swish_call_beta(x2, beta_col)[:, :hw]
        else:
            out2 = _swish_call_beta(x2, beta_col)
        return out2.reshape(n, c, h, w)

    raise ValueError("Swish expects a 2D or 4D input")


def swish_ref(x, beta):
    if x.ndim == 2:
        return x * jax.nn.sigmoid(beta[None, :] * x)
    return x * jax.nn.sigmoid(beta[None, :, None, None] * x)


# ---------------------------------------------------------------------------
# Self-test
# ---------------------------------------------------------------------------

if __name__ == "__main__":
    key = jax.random.PRNGKey(0)
    k1, k2 = jax.random.split(key)

    TOL = dict(atol=1e-3, rtol=1e-3)

    # Case 1: 2D input, Swish(dim=32) -> beta = ones(32) (module init).
    hidden = 32
    x2d = jax.random.normal(k1, (8, hidden), dtype=jnp.float32)
    beta_2d = jnp.ones((hidden,), dtype=jnp.float32)
    y2d = swish_pallas(x2d, beta_2d)
    jax.block_until_ready(y2d)
    assert jnp.allclose(y2d, swish_ref(x2d, beta_2d), **TOL)

    # Case 2: 4D NCHW input, Swish(dim=-1) -> beta = ones(1) (scalar SMEM path,
    # lane-dense flatten, no transposes).
    x4d = jax.random.normal(k2, (2, 4, 16, 16), dtype=jnp.float32)
    beta_4d = jnp.ones((1,), dtype=jnp.float32)
    y4d = swish_pallas(x4d, beta_4d)
    jax.block_until_ready(y4d)
    assert jnp.allclose(y4d, swish_ref(x4d, beta_4d), **TOL)

    # Case 3: non-uniform betas to validate the broadcast/repack logic
    # (2D lane repack + tiled beta row, and 4D per-channel beta column).
    beta_2d_nu = jnp.linspace(0.5, 1.5, hidden, dtype=jnp.float32)
    y2d_nu = swish_pallas(x2d, beta_2d_nu)
    jax.block_until_ready(y2d_nu)
    assert jnp.allclose(y2d_nu, swish_ref(x2d, beta_2d_nu), **TOL)

    beta_chan = jnp.linspace(0.5, 2.0, 4, dtype=jnp.float32)
    y4d_c = swish_pallas(x4d, beta_chan)
    jax.block_until_ready(y4d_c)
    assert jnp.allclose(y4d_c, swish_ref(x4d, beta_chan), **TOL)

    print("KERNEL_OK")
</pallas_src>

<mosaic_0001>
module attributes {stable_mosaic.version = 11 : i64} {
  func.func @_swish_beta_kernel(%arg0: i32, %arg1: memref<1x256xf32, #tpu.memory_space<vmem>>, %arg2: memref<1x256xf32, #tpu.memory_space<vmem>>, %arg3: memref<1x256xf32, #tpu.memory_space<vmem>>) attributes {dimension_semantics = [#tpu.dimension_semantics<parallel>], iteration_bounds = array<i64: 1>, scalar_prefetch = 0 : i64, scratch_operands = 0 : i64, tpu.core_type = #tpu.core_type<tc>, window_params = [{transform_indices = @transform_0, window_bounds = array<i64: 1, 256>}, {pipeline_mode = #tpu.pipeline_mode<synchronous>, transform_indices = @transform_1, window_bounds = array<i64: 1, 256>}, {transform_indices = @transform_2, window_bounds = array<i64: 1, 256>}]} {
    %c0 = arith.constant 0 : index
    %c0_0 = arith.constant 0 : index
    %0 = vector.load %arg1[%c0, %c0_0] : memref<1x256xf32, #tpu.memory_space<vmem>>, vector<1x256xf32>
    %c0_1 = arith.constant 0 : index
    %c0_2 = arith.constant 0 : index
    %1 = vector.load %arg2[%c0_1, %c0_2] : memref<1x256xf32, #tpu.memory_space<vmem>>, vector<1x256xf32>
    %2 = arith.mulf %0, %1 : vector<1x256xf32>
    %cst = arith.constant 5.000000e-01 : f32
    %3 = vector.broadcast %cst : f32 to vector<1x256xf32>
    %4 = arith.mulf %3, %2 : vector<1x256xf32>
    %5 = math.tanh %4 : vector<1x256xf32>
    %cst_3 = arith.constant 5.000000e-01 : f32
    %6 = vector.broadcast %cst_3 : f32 to vector<1x256xf32>
    %7 = arith.mulf %6, %5 : vector<1x256xf32>
    %cst_4 = arith.constant 5.000000e-01 : f32
    %8 = vector.broadcast %cst_4 : f32 to vector<1x256xf32>
    %9 = arith.addf %7, %8 : vector<1x256xf32>
    %10 = arith.mulf %0, %9 : vector<1x256xf32>
    %c0_5 = arith.constant 0 : index
    %c0_6 = arith.constant 0 : index
    %11 = vector.load %arg3[%c0_5, %c0_6] : memref<1x256xf32, #tpu.memory_space<vmem>>, vector<1x256xf32>
    tpu.vector_store %arg3[%c0_5, %c0_6], %10 {strides = array<i32>} : memref<1x256xf32, #tpu.memory_space<vmem>>, vector<1x256xf32>,
    return
  }
  func.func @transform_0(%arg0: i32) -> (i32, i32) {
    %c0_i32 = arith.constant 0 : i32
    %c0_i32_0 = arith.constant 0 : i32
    return %arg0, %c0_i32 : i32, i32
  }
  func.func @transform_1(%arg0: i32) -> (i32, i32) {
    %c0_i32 = arith.constant 0 : i32
    %c0_i32_0 = arith.constant 0 : i32
    %c0_i32_1 = arith.constant 0 : i32
    return %c0_i32, %c0_i32_0 : i32, i32
  }
  func.func @transform_2(%arg0: i32) -> (i32, i32) {
    %c0_i32 = arith.constant 0 : i32
    %c0_i32_0 = arith.constant 0 : i32
    return %arg0, %c0_i32 : i32, i32
  }
}

</mosaic_0001>

<bundles_post_ra>
// kernel: tpu_custom_call.1
= control target key start
LH: loop header
LB: loop body
LE: loop exit
PB: predicated region body
PF: predicated region fallthrough
CT: control target
= control target key end

     0   :  { %7 = vsyncpa [#allocation3], 0  ;;  %s148_s0 = inlined_call_operand.hbm [shape: f32[1,256], index: 0, kind: input, shape index: {}]   ;;  %s149_s1 = inlined_call_operand.vmem [shape: f32[1,256], index: 1, kind: input, shape index: {}]   ;;  %s150_s2 = inlined_call_operand.hbm [shape: f32[1,256], index: 2, kind: output, shape index: {}]  }
   0x1   :  { %8 = vsyncpa [#allocation4], 0  ;;  %s104_s9 = smov [#allocation2]   ;;  %s56_s13 = scalar_lea.hbm %s148_s0, 32 }
   0x2   :  { %s15_s10 = sshll.u32 %s104_s9, 4  ;;  %p57_p0 = scmp.ne.s32.totalorder %s148_s0, %s56_s13  ;;  %s16_s10 = int_to_ptr.vmem [resolvable:$true] %s15_s10 }
   0x3   :  { %p60_p1 = scmp.lt.u32.totalorder %s56_s13, %s148_s0 }
   0x5   :  { %p62_p2 = pnand %p60_p1, %p57_p0 }
   0x7   :  { %65 = shalt.err (!%p62_p2)
}
   0x8   :  { %s66_s18 = scalar_lea.vmem %s16_s10, 32  ;;  %p71_p4 = scmp.lt.s32.totalorder %s16_s10, %s16_s10 }
   0x9   :  { %p67_p3 = scmp.ne.s32.totalorder %s16_s10, %s66_s18  ;;  %p72_p5 = scmp.lt.s32.totalorder %s66_s18, %s66_s18 }
   0xb   :  { %p73_p6 = por %p72_p5, %p71_p4 }
   0xd   :  { %p74_p7 = pnand %p73_p6, %p67_p3 }
   0xf   :  { %77 = shalt.err (!%p74_p7)
}
  0x10   :  { %18 = dma.hbm_to_vmem [thread:$0]  %s148_s0, 32, %s16_s10, [#allocation3]  }
  0x11   :  { %100 = dma.done.wait [#allocation3], 32  }
  0x12   :  { %101 = vsyncadd [#allocation3], 4294967264  ;;  %v24_v0 = vld [vmem:[#allocation2] sm:$0x3]  ;;  %v32_v5 = vlaneseq  ;;  %s105_s23 = smov [#allocation5]  }
  0x13   :  { %v25_v1 = vld [vmem:[%s149_s1] sm:$0x3]  ;;  %s43_s24 = sshll.u32 %s105_s23, 4  ;;  %s44_s24 = int_to_ptr.vmem [resolvable:$true] %s43_s24 }
  0x14   :  { %v26_v2 = vmul.f32 %v25_v1, %v24_v0  ;;  %vm34_vm0 = vcmp.lt.s32.totalorder %v32_v5, 256  ;;  %s78_s0 = scalar_lea.vmem %s44_s24, 32  ;;  %p83_p9 = scmp.lt.s32.totalorder %s44_s24, %s44_s24 }
  0x15   :  { %p79_p8 = scmp.ne.s32.totalorder %s44_s24, %s78_s0  ;;  %p84_p10 = scmp.lt.s32.totalorder %s78_s0, %s78_s0 }
  0x16   :  { %v27_v3 = vmul.f32 0.5, %v26_v2 }
  0x17   :  { %p85_p11 = por %p84_p10, %p83_p9 }
  0x18   :  { %54 = vtanh.f32 %v27_v3 }
  0x19   :  { %p86_p12 = pnand %p85_p11, %p79_p8 }
  0x22   :  { %v55_v4 = vpop.eup %54 }
  0x23   :  { %v29_v6 = vmul.f32 0.5, %v55_v4 }
  0x25   :  { %v30_v7 = vadd.f32 0.5, %v29_v6 }
  0x27   :  { %v31_v8 = vmul.f32 %v30_v7, %v24_v0 }
  0x29   :  { %36 = vst.msk [vmem:[#allocation5] sm:$0x3] %vm34_vm0, %v31_v8 }
  0x2a   :  { %89 = shalt.err (!%p86_p12)
}
  0x2b   :  { %s90_s26 = scalar_lea.hbm %s150_s2, 32 }
  0x2c   :  { %p91_p13 = scmp.ne.s32.totalorder %s150_s2, %s90_s26  ;;  %p94_p0 = scmp.lt.u32.totalorder %s90_s26, %s150_s2 }
  0x2e   :  { %p96_p1 = pnand %p94_p0, %p91_p13 }
  0x30   :  { %99 = shalt.err (!%p96_p1)
}
  0x31   :  { %46 = dma.vmem_to_hbm [thread:$0]  %s44_s24, 32, %s150_s2, [#allocation4]  }
  0x32   :  { %102 = dma.done.wait [#allocation4], 32  }
  0x33   :  { %103 = vsyncadd [#allocation4], 4294967264 }
  0x34   :  { %50 = vsyncpa [#allocation3], 1 }
  0x35   :  { %51 = vsyncpa [#allocation4], 1 }

</bundles_post_ra>
